<compile_context>
chip_gen: v5e
topology: v5e:2x2
jax: 0.10.0
libtpu: 0.0.40
codegen_flags: <defaults>
</compile_context>

<pallas_src>
import jax
import jax.numpy as jnp
from jax.experimental import pallas as pl
from jax.experimental.pallas import tpu as pltpu

IN_FEATURES = 128          # in_features / hidden dim of the fusion features
IMAGE_FE_LAST_DIM = 256
GEM_P = 3.0                # ImageGeM learnable power, at its init value
GEM_EPS = 1e-6             # ImageGeM clamp eps
L2_EPS = 1e-12             # F.normalize eps


def _ffb_kernel(img_ref, cld_ref, wcat_ref, bcat_ref,
                fusion_ref, img128_ref, cld128_ref, img256_ref,
                gem128_ref, gem256_ref):
    B, n_img, C = img_ref.shape
    n_cld = cld_ref.shape[1]
    n_tot = n_img + n_cld
    D = wcat_ref.shape[1] // 2

    img = img_ref[...]                    # (B, N_img, 128)
    cld = cld_ref[...]                    # (B, N_cld, 128)

    # F.normalize(p=2, dim=-1): x / max(||x||, 1e-12) == x * rsqrt(max(||x||^2, eps^2))
    img_n = img * jax.lax.rsqrt(
        jnp.maximum(jnp.sum(img * img, axis=-1, keepdims=True), L2_EPS * L2_EPS))
    cld_n = cld * jax.lax.rsqrt(
        jnp.maximum(jnp.sum(cld * cld, axis=-1, keepdims=True), L2_EPS * L2_EPS))

    # Emit the per-modality slices directly (PyTorch returns views of fusion_feat).
    img128_ref[...] = img_n
    cld128_ref[...] = cld_n

    # fusion_feat = torch.cat([image, cloud], dim=1): one sublane concat + one store.
    # TODO(synk): the GattBlock stacks (gatt_fusion/image/cloud lists) are external,
    # config-dependent attention classes; treated as identity here.
    fusion = jnp.concatenate([img_n, cld_n], axis=1)         # (B, N_tot, 128)
    fusion_ref[...] = fusion

    # fusion_gem_128: (mean_n clamp(x,eps)^p)^(1/p); p == 3 -> cube on the VPU.
    # TODO(synk): GeM p is learnable in PyTorch; pass it as an SMEM scalar and
    # guard the cube specialization on p == 3 if loading trained checkpoints.
    x = jnp.maximum(fusion, GEM_EPS)
    g128 = jnp.mean(x * x * x, axis=1)                       # (B, 128), > 0
    gem128_ref[...] = jnp.exp(jnp.log(g128) * (1.0 / GEM_P))

    # One fused MXU pass for both 128->256 linears:
    #   (B*N_tot, 128) x (128, 512)   cols [:256] = fc128_256, [256:] = fc128_256_image
    out2d = jnp.dot(fusion.reshape(B * n_tot, C), wcat_ref[...],
                    preferred_element_type=jnp.float32) + bcat_ref[...]
    out3d = out2d.reshape(B, n_tot, 2 * D)

    # 'fconfusion' branch: GeM( fc128_256(fusion_feat) )
    f256 = out3d[:, :, :D]
    x256 = jnp.maximum(f256, GEM_EPS)
    g256 = jnp.mean(x256 * x256 * x256, axis=1)              # (B, 256), > 0
    gem256_ref[...] = jnp.exp(jnp.log(g256) * (1.0 / GEM_P))

    # fc128_256_image applied to the image slice of fusion_feat.
    img256_ref[...] = out3d[:, :n_img, D:]


@jax.jit
def ffb_forward(in_image_feat, in_cloud_feat, params):
    B, n_img, C = in_image_feat.shape
    _, n_cld, _ = in_cloud_feat.shape
    n_tot = n_img + n_cld
    D = params["w256"].shape[1]

    out_shapes = (
        jax.ShapeDtypeStruct((B, n_tot, C), jnp.float32),    # fusion_feat
        jax.ShapeDtypeStruct((B, n_img, C), jnp.float32),    # image_feat_128
        jax.ShapeDtypeStruct((B, n_cld, C), jnp.float32),    # cloud_feat
        jax.ShapeDtypeStruct((B, n_img, D), jnp.float32),    # image_feat_256
        jax.ShapeDtypeStruct((B, C), jnp.float32),           # gem_128
        jax.ShapeDtypeStruct((B, D), jnp.float32),           # gem_256
    )

    # Single grid-less invocation: inputs/outputs are whole-array VMEM refs.
    # (On v7x with larger B one could reintroduce a size-2 "parallel" batch axis
    # so both TensorCores get work.)
    fusion, img128, cld128, img256, gem128, gem256 = pl.pallas_call(
        _ffb_kernel,
        out_shape=out_shapes,
    )(in_image_feat, in_cloud_feat, params["wcat"], params["bcat"])

    return {
        "output_image_feat_128": img128,     # (B, N_img, 128)
        "output_image_feat_256": img256,     # (B, N_img, 256)
        "output_cloud_feat": cld128,         # (B, N_cld, 128)
        "output_fusion_feat": fusion,        # (B, N_tot, 128)
        "output_feat_gem_128": gem128,       # (B, 128)
        "output_feat_gem_256": gem256,       # (B, 256)
    }


def ffb_reference(img, cld, params):
    """Pure-JAX reference mirroring the PyTorch forward."""
    def l2n(x):
        n = jnp.sqrt(jnp.sum(x * x, axis=-1, keepdims=True))
        return x / jnp.maximum(n, L2_EPS)

    def gem(x):  # x: (B, N, C) -> (B, C)
        return jnp.mean(jnp.maximum(x, GEM_EPS) ** GEM_P, axis=1) ** (1.0 / GEM_P)

    img_n, cld_n = l2n(img), l2n(cld)
    fusion = jnp.concatenate([img_n, cld_n], axis=1)
    n_img = img.shape[1]
    f256 = fusion @ params["w256"] + params["b256"][0]
    img256 = fusion[:, :n_img] @ params["w256_img"] + params["b256_img"][0]
    return {
        "output_image_feat_128": fusion[:, :n_img],
        "output_image_feat_256": img256,
        "output_cloud_feat": fusion[:, n_img:],
        "output_fusion_feat": fusion,
        "output_feat_gem_128": gem(fusion),
        "output_feat_gem_256": gem(f256),
    }


def init_params(key, in_features=IN_FEATURES, out_dim=IMAGE_FE_LAST_DIM):
    # Deterministic synthetic init for the two nn.Linear(128, image_fe_last_dim)
    # layers.  Weights stored pre-transposed as (in, out) for x @ W.
    k1, k2, k3, k4 = jax.random.split(key, 4)
    scale = 1.0 / jnp.sqrt(in_features)
    w256 = jax.random.uniform(k1, (in_features, out_dim), jnp.float32, -scale, scale)
    b256 = jax.random.uniform(k2, (1, out_dim), jnp.float32, -scale, scale)
    w256_img = jax.random.uniform(k3, (in_features, out_dim), jnp.float32, -scale, scale)
    b256_img = jax.random.uniform(k4, (1, out_dim), jnp.float32, -scale, scale)
    return {
        "w256": w256, "b256": b256,
        "w256_img": w256_img, "b256_img": b256_img,
        # Host-side fusion of the two linears into a single (128, 512) matmul.
        "wcat": jnp.concatenate([w256, w256_img], axis=1),
        "bcat": jnp.concatenate([b256, b256_img], axis=1),
    }


if __name__ == "__main__":
    key = jax.random.PRNGKey(0)
    k_img, k_cld, k_par = jax.random.split(key, 3)

    B, N_IMG, N_CLD = 2, 16, 8
    in_image_feat = jax.random.normal(k_img, (B, N_IMG, IN_FEATURES), jnp.float32)
    in_cloud_feat = jax.random.normal(k_cld, (B, N_CLD, IN_FEATURES), jnp.float32)
    params = init_params(k_par)

    out = ffb_forward(in_image_feat, in_cloud_feat, params)
    out = jax.block_until_ready(out)

    ref = ffb_reference(in_image_feat, in_cloud_feat, params)
    for name in ref:
        assert out[name].shape == ref[name].shape, name
        assert jnp.allclose(out[name], ref[name], rtol=2e-3, atol=2e-4), name

    print("KERNEL_OK")
</pallas_src>

<mosaic_0001>
module attributes {stable_mosaic.version = 11 : i64} {
  func.func @_ffb_kernel(%arg0: memref<2x16x128xf32, #tpu.memory_space<vmem>>, %arg1: memref<2x8x128xf32, #tpu.memory_space<vmem>>, %arg2: memref<128x512xf32, #tpu.memory_space<vmem>>, %arg3: memref<1x512xf32, #tpu.memory_space<vmem>>, %arg4: memref<2x24x128xf32, #tpu.memory_space<vmem>>, %arg5: memref<2x16x128xf32, #tpu.memory_space<vmem>>, %arg6: memref<2x8x128xf32, #tpu.memory_space<vmem>>, %arg7: memref<2x16x256xf32, #tpu.memory_space<vmem>>, %arg8: memref<2x128xf32, #tpu.memory_space<vmem>>, %arg9: memref<2x256xf32, #tpu.memory_space<vmem>>) attributes {dimension_semantics = [], scalar_prefetch = 0 : i64, scratch_operands = 0 : i64, tpu.core_type = #tpu.core_type<tc>} {
    %c0 = arith.constant 0 : index
    %c0_0 = arith.constant 0 : index
    %c0_1 = arith.constant 0 : index
    %0 = vector.load %arg0[%c0, %c0_0, %c0_1] : memref<2x16x128xf32, #tpu.memory_space<vmem>>, vector<2x16x128xf32>
    %c0_2 = arith.constant 0 : index
    %c0_3 = arith.constant 0 : index
    %c0_4 = arith.constant 0 : index
    %1 = vector.load %arg1[%c0_2, %c0_3, %c0_4] : memref<2x8x128xf32, #tpu.memory_space<vmem>>, vector<2x8x128xf32>
    %2 = arith.mulf %0, %0 : vector<2x16x128xf32>
    %cst = arith.constant dense<0.000000e+00> : vector<2x16xf32>
    %3 = vector.multi_reduction <add>, %2, %cst [2] : vector<2x16x128xf32> to vector<2x16xf32>
    %4 = vector.shape_cast %3 : vector<2x16xf32> to vector<2x16x1xf32>
    %cst_5 = arith.constant 1.000000e-24 : f32
    %5 = vector.broadcast %cst_5 : f32 to vector<2x16x1xf32>
    %6 = arith.maximumf %4, %5 : vector<2x16x1xf32>
    %7 = math.rsqrt %6 : vector<2x16x1xf32>
    %8 = vector.broadcast %7 : vector<2x16x1xf32> to vector<2x16x128xf32>
    %9 = arith.mulf %0, %8 : vector<2x16x128xf32>
    %10 = arith.mulf %1, %1 : vector<2x8x128xf32>
    %cst_6 = arith.constant dense<0.000000e+00> : vector<2x8xf32>
    %11 = vector.multi_reduction <add>, %10, %cst_6 [2] : vector<2x8x128xf32> to vector<2x8xf32>
    %12 = vector.shape_cast %11 : vector<2x8xf32> to vector<2x8x1xf32>
    %cst_7 = arith.constant 1.000000e-24 : f32
    %13 = vector.broadcast %cst_7 : f32 to vector<2x8x1xf32>
    %14 = arith.maximumf %12, %13 : vector<2x8x1xf32>
    %15 = math.rsqrt %14 : vector<2x8x1xf32>
    %16 = vector.broadcast %15 : vector<2x8x1xf32> to vector<2x8x128xf32>
    %17 = arith.mulf %1, %16 : vector<2x8x128xf32>
    %c0_8 = arith.constant 0 : index
    %c0_9 = arith.constant 0 : index
    %c0_10 = arith.constant 0 : index
    %18 = vector.load %arg5[%c0_8, %c0_9, %c0_10] : memref<2x16x128xf32, #tpu.memory_space<vmem>>, vector<2x16x128xf32>
    tpu.vector_store %arg5[%c0_8, %c0_9, %c0_10], %9 {strides = array<i32>} : memref<2x16x128xf32, #tpu.memory_space<vmem>>, vector<2x16x128xf32>,
    %c0_11 = arith.constant 0 : index
    %c0_12 = arith.constant 0 : index
    %c0_13 = arith.constant 0 : index
    %19 = vector.load %arg6[%c0_11, %c0_12, %c0_13] : memref<2x8x128xf32, #tpu.memory_space<vmem>>, vector<2x8x128xf32>
    tpu.vector_store %arg6[%c0_11, %c0_12, %c0_13], %17 {strides = array<i32>} : memref<2x8x128xf32, #tpu.memory_space<vmem>>, vector<2x8x128xf32>,
    %20 = tpu.concatenate %9, %17 in 1 : vector<2x16x128xf32>, vector<2x8x128xf32> -> vector<2x24x128xf32>
    %c0_14 = arith.constant 0 : index
    %c0_15 = arith.constant 0 : index
    %c0_16 = arith.constant 0 : index
    %21 = vector.load %arg4[%c0_14, %c0_15, %c0_16] : memref<2x24x128xf32, #tpu.memory_space<vmem>>, vector<2x24x128xf32>
    tpu.vector_store %arg4[%c0_14, %c0_15, %c0_16], %20 {strides = array<i32>} : memref<2x24x128xf32, #tpu.memory_space<vmem>>, vector<2x24x128xf32>,
    %cst_17 = arith.constant 9.99999997E-7 : f32
    %22 = vector.broadcast %cst_17 : f32 to vector<2x24x128xf32>
    %23 = arith.maximumf %20, %22 : vector<2x24x128xf32>
    %24 = arith.mulf %23, %23 : vector<2x24x128xf32>
    %25 = arith.mulf %24, %23 : vector<2x24x128xf32>
    %cst_18 = arith.constant dense<0.000000e+00> : vector<2x128xf32>
    %26 = vector.multi_reduction <add>, %25, %cst_18 [1] : vector<2x24x128xf32> to vector<2x128xf32>
    %cst_19 = arith.constant 2.400000e+01 : f32
    %27 = vector.broadcast %cst_19 : f32 to vector<2x128xf32>
    %28 = arith.divf %26, %27 : vector<2x128xf32>
    %29 = math.log %28 : vector<2x128xf32>
    %cst_20 = arith.constant 0.333333343 : f32
    %30 = vector.broadcast %cst_20 : f32 to vector<2x128xf32>
    %31 = arith.mulf %29, %30 : vector<2x128xf32>
    %32 = math.exp %31 : vector<2x128xf32>
    %c0_21 = arith.constant 0 : index
    %c0_22 = arith.constant 0 : index
    %33 = vector.load %arg8[%c0_21, %c0_22] : memref<2x128xf32, #tpu.memory_space<vmem>>, vector<2x128xf32>
    tpu.vector_store %arg8[%c0_21, %c0_22], %32 {strides = array<i32>} : memref<2x128xf32, #tpu.memory_space<vmem>>, vector<2x128xf32>,
    %34 = vector.shape_cast %20 : vector<2x24x128xf32> to vector<48x128xf32>
    %c0_23 = arith.constant 0 : index
    %c0_24 = arith.constant 0 : index
    %35 = vector.load %arg2[%c0_23, %c0_24] : memref<128x512xf32, #tpu.memory_space<vmem>>, vector<128x512xf32>
    %cst_25 = arith.constant dense<0.000000e+00> : vector<48x512xf32>
    %36 = tpu.matmul %34, %35, %cst_25 {dimension_numbers = #tpu.dot_dimension_numbers<[1], [0], [0], [1], [0, 0, 1, 1], [], []>} : vector<48x128xf32>, vector<128x512xf32>, vector<48x512xf32> -> vector<48x512xf32>
    %c0_26 = arith.constant 0 : index
    %c0_27 = arith.constant 0 : index
    %37 = vector.load %arg3[%c0_26, %c0_27] : memref<1x512xf32, #tpu.memory_space<vmem>>, vector<1x512xf32>
    %38 = vector.broadcast %37 : vector<1x512xf32> to vector<48x512xf32>
    %39 = arith.addf %36, %38 : vector<48x512xf32>
    %40 = vector.shape_cast %39 : vector<48x512xf32> to vector<2x24x512xf32>
    %41 = vector.extract_strided_slice %40 {offsets = [0, 0, 0], sizes = [2, 24, 256], strides = [1, 1, 1]} : vector<2x24x512xf32> to vector<2x24x256xf32>
    %cst_28 = arith.constant 9.99999997E-7 : f32
    %42 = vector.broadcast %cst_28 : f32 to vector<2x24x256xf32>
    %43 = arith.maximumf %41, %42 : vector<2x24x256xf32>
    %44 = arith.mulf %43, %43 : vector<2x24x256xf32>
    %45 = arith.mulf %44, %43 : vector<2x24x256xf32>
    %cst_29 = arith.constant dense<0.000000e+00> : vector<2x256xf32>
    %46 = vector.multi_reduction <add>, %45, %cst_29 [1] : vector<2x24x256xf32> to vector<2x256xf32>
    %cst_30 = arith.constant 2.400000e+01 : f32
    %47 = vector.broadcast %cst_30 : f32 to vector<2x256xf32>
    %48 = arith.divf %46, %47 : vector<2x256xf32>
    %49 = math.log %48 : vector<2x256xf32>
    %cst_31 = arith.constant 0.333333343 : f32
    %50 = vector.broadcast %cst_31 : f32 to vector<2x256xf32>
    %51 = arith.mulf %49, %50 : vector<2x256xf32>
    %52 = math.exp %51 : vector<2x256xf32>
    %c0_32 = arith.constant 0 : index
    %c0_33 = arith.constant 0 : index
    %53 = vector.load %arg9[%c0_32, %c0_33] : memref<2x256xf32, #tpu.memory_space<vmem>>, vector<2x256xf32>
    tpu.vector_store %arg9[%c0_32, %c0_33], %52 {strides = array<i32>} : memref<2x256xf32, #tpu.memory_space<vmem>>, vector<2x256xf32>,
    %54 = vector.extract_strided_slice %40 {offsets = [0, 0, 256], sizes = [2, 16, 256], strides = [1, 1, 1]} : vector<2x24x512xf32> to vector<2x16x256xf32>
    %c0_34 = arith.constant 0 : index
    %c0_35 = arith.constant 0 : index
    %c0_36 = arith.constant 0 : index
    %55 = vector.load %arg7[%c0_34, %c0_35, %c0_36] : memref<2x16x256xf32, #tpu.memory_space<vmem>>, vector<2x16x256xf32>
    tpu.vector_store %arg7[%c0_34, %c0_35, %c0_36], %54 {strides = array<i32>} : memref<2x16x256xf32, #tpu.memory_space<vmem>>, vector<2x16x256xf32>,
    return
  }
}

</mosaic_0001>

<bundles_post_ra>
// kernel: ffb_forward.1
= control target key start
LH: loop header
LB: loop body
LE: loop exit
PB: predicated region body
PF: predicated region fallthrough
CT: control target
= control target key end

     0   :  { %15 = vsyncpa [#allocation3], 0  ;;  %s1249_s0 = inlined_call_operand.hbm [shape: f32[2,16,128], index: 0, kind: input, shape index: {}]   ;;  %s1250_s1 = inlined_call_operand.hbm [shape: f32[2,8,128], index: 1, kind: input, shape index: {}]   ;;  %s1251_s2 = inlined_call_operand.hbm [shape: f32[128,512], index: 2, kind: input, shape index: {}]   ;;  %s1252_s3 = inlined_call_operand.hbm [shape: f32[1,512], index: 3, kind: input, shape index: {}]   ;;  %s1253_s4 = inlined_call_operand.hbm [shape: f32[2,24,128], index: 4, kind: output, shape index: {0}]   ;;  %s1254_s5 = inlined_call_operand.hbm [shape: f32[2,16,128], index: 5, kind: output, shape index: {1}]   ;;  %s1255_s6 = inlined_call_operand.hbm [shape: f32[2,8,128], index: 6, kind: output, shape index: {2}]   ;;  %s1256_s7 = inlined_call_operand.hbm [shape: f32[2,16,256], index: 7, kind: output, shape index: {3}]   ;;  %s1257_s8 = inlined_call_operand.hbm [shape: f32[2,128], index: 8, kind: output, shape index: {4}]   ;;  %s1258_s9 = inlined_call_operand.hbm [shape: f32[2,256], index: 9, kind: output, shape index: {5}]  }
   0x1   :  { %16 = vsyncpa [#allocation6], 0 }
   0x2   :  { %17 = vsyncpa [#allocation9], 0 }
   0x3   :  { %18 = vsyncpa [#allocation4], 0 }
   0x4   :  { %19 = vsyncpa [#allocation12], 0 }
   0x5   :  { %20 = vsyncpa [#allocation15], 0 }
   0x6   :  { %21 = vsyncpa [#allocation18], 0  ;;  %s39_s11 = sshll.u32 %s1250_s1, 4  ;;  %s1002_s12 = smov [#allocation5]   ;;  %s40_s11 = int_to_ptr.hbm [resolvable:$true] %s39_s11 }
   0x7   :  { %s41_s13 = sshll.u32 %s1002_s12, 4  ;;  %s26_s16 = sshll.u32 %s1249_s0, 4  ;;  %s42_s13 = int_to_ptr.vmem [resolvable:$true] %s41_s13  ;;  %s27_s16 = int_to_ptr.hbm [resolvable:$true] %s26_s16 }
   0x8   :  { %s1003_s17 = smov 128   ;;  %s1004_s18 = smov 8  }
   0x9   :  { %47 = dma.hbm_to_vmem [thread:$0]  %s40_s11, 256, %s42_s13, [#allocation6], %s1003_s17, %s1003_s17, %s1004_s18  }
   0xa   :  { %s1005_s19 = smov [#allocation2]   ;;  %s52_s1 = sshll.u32 %s1251_s2, 4  ;;  %s53_s1 = int_to_ptr.hbm [resolvable:$true] %s52_s1 }
   0xb   :  { %s28_s20 = sshll.u32 %s1005_s19, 4  ;;  %s1006_s0 = smov [#allocation7]   ;;  %s29_s20 = int_to_ptr.vmem [resolvable:$true] %s28_s20 }
   0xc   :  { %34 = dma.hbm_to_vmem [thread:$0]  %s27_s16, 512, %s29_s20, [#allocation3], %s1003_s17, %s1003_s17, %s1004_s18  }
   0xd   :  { %s54_s23 = sshll.u32 %s1006_s0, 4  ;;  %s66_s26 = sshll.u32 %s1252_s3, 4  ;;  %s55_s23 = int_to_ptr.vmem [resolvable:$true] %s54_s23  ;;  %s67_s26 = int_to_ptr.hbm [resolvable:$true] %s66_s26 }
   0xe   :  { %s1007_s27 = smov 512   ;;  %s1008_s28 = smov 32  }
   0xf   :  { %60 = dma.hbm_to_vmem [thread:$0]  %s53_s1, 8192, %s55_s23, [#allocation6], %s1007_s27, %s1007_s27, %s1008_s28  }
  0x10   :  { %s1009_s29 = smov [#allocation8]  }
  0x11   :  { %s68_s30 = sshll.u32 %s1009_s29, 4  ;;  %s69_s30 = int_to_ptr.vmem [resolvable:$true] %s68_s30 }
  0x12   :  { %71 = dma.hbm_to_vmem [thread:$0]  %s67_s26, 64, %s69_s30, [#allocation9]  }
  0x13   :  { %988 = dma.done.wait [#allocation3], 512  }
  0x14   :  { %989 = vsyncadd [#allocation3], 4294966784 }
  0x15   :  { %990 = dma.done.wait [#allocation6], 8448  }
  0x16   :  { %991 = vsyncadd [#allocation6], 4294958848 }
  0x17   :  { %992 = dma.done.wait [#allocation9], 64  }
  0x18   :  { %993 = vsyncadd [#allocation9], 4294967232  ;;  %v1087_v0 = vld [vmem:[#allocation5] sm:$0xff]  ;;  %v1091_v2 = vld [vmem:[#allocation2 + $0x18] sm:$0xff]  ;;  %s607_s10 = sshll.u32 %s1254_s5, 4  ;;  %s1011_s11 = smov [#allocation11]   ;;  %s608_s10 = int_to_ptr.hbm [resolvable:$true] %s607_s10 }
  0x19   :  { %v1089_v1 = vld [vmem:[#allocation2] sm:$0xff]  ;;  %v154_v3 = vmul.f32 %v1087_v0, %v1087_v0  ;;  %v97_v5 = vmul.f32 %v1091_v2, %v1091_v2  ;;  %v315_v6 = vld [vmem:[#allocation7 + $0x1e0] sm:$0xff]  ;;  %v316_v7 = vld [vmem:[#allocation7 + $0x1e8] sm:$0xff]  ;;  %s605_s12 = sshll.u32 %s1011_s11, 4  ;;  %s594_s15 = sshll.u32 %s1253_s4, 4  ;;  %s606_s12 = int_to_ptr.vmem [resolvable:$true] %s605_s12  ;;  %s595_s15 = int_to_ptr.hbm [resolvable:$true] %s594_s15 }
  0x1a   :  { %v94_v4 = vmul.f32 %v1089_v1, %v1089_v1  ;;  %v317_v8 = vld [vmem:[#allocation7 + $0x1f0] sm:$0xff]  ;;  %v1099_v9 = vld [vmem:[#allocation2 + $0x10] sm:$0xff]  ;;  %v318_v10 = vld [vmem:[#allocation7 + $0x1f8] sm:$0xff]  ;;  %329 = vmatpush.msra.mxu0 %v315_v6  ;;  %364 = vmatpush.msra.mxu1 %v316_v7  ;;  %s1012_s16 = smov [#allocation10]   ;;  %s1013_s5 = smov [#allocation13]  }
  0x1b   :  { %156 = vadd.xlane.f32.xlu1 %v154_v3  ;;  %v311_v11 = vld [vmem:[#allocation7 + $0x1c0] sm:$0xff]  ;;  %104 = vadd.xlane.f32.xlu2 %v97_v5  ;;  %v1101_v12 = vld [vmem:[#allocation2 + $0x8] sm:$0xff]  ;;  %v312_v13 = vld [vmem:[#allocation7 + $0x1c8] sm:$0xff]  ;;  %v96_v20 = vmul.f32 %v1099_v9, %v1099_v9  ;;  %s592_s19 = sshll.u32 %s1012_s16, 4  ;;  %s618_s20 = sshll.u32 %s1013_s5, 4  ;;  %s593_s19 = int_to_ptr.vmem [resolvable:$true] %s592_s19  ;;  %s619_s20 = int_to_ptr.vmem [resolvable:$true] %s618_s20 }
  0x1c   :  { %98 = vadd.xlane.f32.xlu0 %v94_v4  ;;  %v313_v14 = vld [vmem:[#allocation7 + $0x1d0] sm:$0xff]  ;;  %v1103_v15 = vld [vmem:[#allocation5 + $0x8] sm:$0xff]  ;;  %399 = vmatpush.msra.mxu2 %v317_v8  ;;  %v307_v17 = vld [vmem:[#allocation7 + $0x1a0] sm:$0xff]  ;;  %v95_v21 = vmul.f32 %v1101_v12, %v1101_v12  ;;  %s620_s1 = sshll.u32 %s1255_s6, 4  ;;  %s1014_s4 = smov [#allocation14]   ;;  %s621_s1 = int_to_ptr.hbm [resolvable:$true] %s620_s1 }
  0x1d   :  { %v314_v16 = vld [vmem:[#allocation7 + $0x1d8] sm:$0xff]  ;;  %432 = vmatpush.msra.mxu3 %v318_v10  ;;  %330 = vmatpush.msra.mxu0 %v311_v11  ;;  %v308_v18 = vld [vmem:[#allocation7 + $0x1a8] sm:$0xff]  ;;  %v309_v19 = vld [vmem:[#allocation7 + $0x1b0] sm:$0xff]  ;;  %v155_v24 = vmul.f32 %v1103_v15, %v1103_v15  ;;  %s1225_s6 = sshll.u32 %s1014_s4, 4  ;;  %s633_s0 = sshll.u32 %s1256_s7, 4  ;;  %s632_s6 = int_to_ptr.vmem [resolvable:$true] %s1225_s6  ;;  %s634_s0 = int_to_ptr.hbm [resolvable:$true] %s633_s0 }
  0x1e   :  { %365 = vmatpush.msra.mxu1 %v312_v13  ;;  %400 = vmatpush.msra.mxu2 %v313_v14  ;;  %v310_v22 = vld [vmem:[#allocation7 + $0x1b8] sm:$0xff]  ;;  %v303_v23 = vld [vmem:[#allocation7 + $0x180] sm:$0xff]  ;;  %v304_v25 = vld [vmem:[#allocation7 + $0x188] sm:$0xff]  ;;  %s1015_s23 = smov [#allocation16]   ;;  %s647_s27 = sshll.u32 %s1257_s8, 4  ;;  %s648_s27 = int_to_ptr.hbm [resolvable:$true] %s647_s27 }
  0x1f   :  { %433 = vmatpush.msra.mxu3 %v314_v16  ;;  %331 = vmatpush.msra.mxu0 %v307_v17  ;;  %v305_v26 = vld [vmem:[#allocation7 + $0x190] sm:$0xff]  ;;  %v306_v27 = vld [vmem:[#allocation7 + $0x198] sm:$0xff]  ;;  %v299_v28 = vld [vmem:[#allocation7 + $0x160] sm:$0xff]  ;;  %s1230_s24 = sshll.u32 %s1015_s23, 4  ;;  %s1016_s7 = smov 256   ;;  %s646_s24 = int_to_ptr.vmem [resolvable:$true] %s1230_s24 }
  0x20   :  { %366 = vmatpush.msra.mxu1 %v308_v18  ;;  %401 = vmatpush.msra.mxu2 %v309_v19  ;;  %v300_v29 = vld [vmem:[#allocation7 + $0x168] sm:$0xff]  ;;  %v301_v30 = vld [vmem:[#allocation7 + $0x170] sm:$0xff]  ;;  %v302_v31 = vld [vmem:[#allocation7 + $0x178] sm:$0xff]  ;;  %s1017_s8 = smov 16   ;;  %s1018_s28 = smov [#allocation17]  }
  0x21   :  { %434 = vmatpush.msra.mxu3 %v310_v22  ;;  %332 = vmatpush.msra.mxu0 %v303_v23  ;;  %v295_v32 = vld [vmem:[#allocation7 + $0x140] sm:$0xff]  ;;  %v296_v33 = vld [vmem:[#allocation7 + $0x148] sm:$0xff]  ;;  %v297_v34 = vld [vmem:[#allocation7 + $0x150] sm:$0xff]  ;;  %s656_s29 = sshll.u32 %s1018_s28, 4  ;;  %s658_s3 = sshll.u32 %s1258_s9, 4  ;;  %s657_s29 = int_to_ptr.vmem [resolvable:$true] %s656_s29  ;;  %s659_s3 = int_to_ptr.hbm [resolvable:$true] %s658_s3 }
  0x22   :  { %367 = vmatpush.msra.mxu1 %v304_v25  ;;  %402 = vmatpush.msra.mxu2 %v305_v26  ;;  %v298_v35 = vld [vmem:[#allocation7 + $0x158] sm:$0xff]  ;;  %v291_v36 = vld [vmem:[#allocation7 + $0x120] sm:$0xff]  ;;  %v292_v37 = vld [vmem:[#allocation7 + $0x128] sm:$0xff] }
  0x23   :  { %102 = vadd.xlane.f32.xlu1 %v96_v20  ;;  %158 = vadd.xlane.f32.xlu2 %v155_v24  ;;  %v293_v38 = vld [vmem:[#allocation7 + $0x130] sm:$0xff]  ;;  %v294_v39 = vld [vmem:[#allocation7 + $0x138] sm:$0xff]  ;;  %v287_v40 = vld [vmem:[#allocation7 + $0x100] sm:$0xff] }
  0x24   :  { %100 = vadd.xlane.f32.xlu0 %v95_v21  ;;  %435 = vmatpush.msra.mxu3 %v306_v27  ;;  %v288_v41 = vld [vmem:[#allocation7 + $0x108] sm:$0xff]  ;;  %v289_v42 = vld [vmem:[#allocation7 + $0x110] sm:$0xff]  ;;  %v290_v43 = vld [vmem:[#allocation7 + $0x118] sm:$0xff] }
  0x25   :  { %333 = vmatpush.msra.mxu0 %v299_v28  ;;  %368 = vmatpush.msra.mxu1 %v300_v29  ;;  %v283_v44 = vld [vmem:[#allocation7 + $0xe0] sm:$0xff]  ;;  %v284_v45 = vld [vmem:[#allocation7 + $0xe8] sm:$0xff]  ;;  %v285_v46 = vld [vmem:[#allocation7 + $0xf0] sm:$0xff] }
  0x26   :  { %403 = vmatpush.msra.mxu2 %v301_v30  ;;  %436 = vmatpush.msra.mxu3 %v302_v31  ;;  %v286_v47 = vld [vmem:[#allocation7 + $0xf8] sm:$0xff]  ;;  %v279_v48 = vld [vmem:[#allocation7 + $0xc0] sm:$0xff]  ;;  %v280_v49 = vld [vmem:[#allocation7 + $0xc8] sm:$0xff] }
  0x27   :  { %334 = vmatpush.msra.mxu0 %v295_v32  ;;  %369 = vmatpush.msra.mxu1 %v296_v33  ;;  %v281_v50 = vld [vmem:[#allocation7 + $0xd0] sm:$0xff]  ;;  %v282_v51 = vld [vmem:[#allocation7 + $0xd8] sm:$0xff]  ;;  %v275_v52 = vld [vmem:[#allocation7 + $0xa0] sm:$0xff] }
  0x28   :  { %404 = vmatpush.msra.mxu2 %v297_v34  ;;  %437 = vmatpush.msra.mxu3 %v298_v35  ;;  %v276_v53 = vld [vmem:[#allocation7 + $0xa8] sm:$0xff]  ;;  %v277_v54 = vld [vmem:[#allocation7 + $0xb0] sm:$0xff]  ;;  %v278_v55 = vld [vmem:[#allocation7 + $0xb8] sm:$0xff] }
  0x29   :  { %335 = vmatpush.msra.mxu0 %v291_v36  ;;  %370 = vmatpush.msra.mxu1 %v292_v37  ;;  %v271_v56 = vld [vmem:[#allocation7 + $0x80] sm:$0xff]  ;;  %v272_v57 = vld [vmem:[#allocation7 + $0x88] sm:$0xff]  ;;  %v273_v58 = vld [vmem:[#allocation7 + $0x90] sm:$0xff] }
  0x2a   :  { %405 = vmatpush.msra.mxu2 %v293_v38  ;;  %438 = vmatpush.msra.mxu3 %v294_v39  ;;  %v274_v59 = vld [vmem:[#allocation7 + $0x98] sm:$0xff]  ;;  %v267_v60 = vld [vmem:[#allocation7 + $0x60] sm:$0xff]  ;;  %v268_v61 = vld [vmem:[#allocation7 + $0x68] sm:$0xff] }
  0x2b   :  { %336 = vmatpush.msra.mxu0 %v287_v40  ;;  %371 = vmatpush.msra.mxu1 %v288_v41  ;;  %v269_v62 = vld [vmem:[#allocation7 + $0x70] sm:$0xff]  ;;  %v270_v63 = vld [vmem:[#allocation7 + $0x78] sm:$0xff]  ;;  %v263_v3 = vld [vmem:[#allocation7 + $0x40] sm:$0xff] }
  0x2c   :  { %406 = vmatpush.msra.mxu2 %v289_v42  ;;  %439 = vmatpush.msra.mxu3 %v290_v43  ;;  %v264_v4 = vld [vmem:[#allocation7 + $0x48] sm:$0xff]  ;;  %v265_v5 = vld [vmem:[#allocation7 + $0x50] sm:$0xff]  ;;  %v266_v6 = vld [vmem:[#allocation7 + $0x58] sm:$0xff] }
  0x2d   :  { %337 = vmatpush.msra.mxu0 %v283_v44  ;;  %372 = vmatpush.msra.mxu1 %v284_v45  ;;  %v259_v7 = vld [vmem:[#allocation7 + $0x20] sm:$0xff]  ;;  %v260_v8 = vld [vmem:[#allocation7 + $0x28] sm:$0xff]  ;;  %v261_v10 = vld [vmem:[#allocation7 + $0x30] sm:$0xff] }
  0x2e   :  { %407 = vmatpush.msra.mxu2 %v285_v46  ;;  %440 = vmatpush.msra.mxu3 %v286_v47  ;;  %v262_v11 = vld [vmem:[#allocation7 + $0x38] sm:$0xff]  ;;  %v255_v13 = vld [vmem:[#allocation7] sm:$0xff]  ;;  %v256_v14 = vld [vmem:[#allocation7 + $0x8] sm:$0xff] }
  0x2f   :  { %338 = vmatpush.msra.mxu0 %v279_v48  ;;  %373 = vmatpush.msra.mxu1 %v280_v49  ;;  %v257_v16 = vld [vmem:[#allocation7 + $0x10] sm:$0xff]  ;;  %v258_v17 = vld [vmem:[#allocation7 + $0x18] sm:$0xff] }
  0x30   :  { %408 = vmatpush.msra.mxu2 %v281_v50  ;;  %441 = vmatpush.msra.mxu3 %v282_v51 }
  0x31   :  { %339 = vmatpush.msra.mxu0 %v275_v52  ;;  %374 = vmatpush.msra.mxu1 %v276_v53 }
  0x32   :  { %409 = vmatpush.msra.mxu2 %v277_v54  ;;  %442 = vmatpush.msra.mxu3 %v278_v55 }
  0x33   :  { %340 = vmatpush.msra.mxu0 %v271_v56  ;;  %375 = vmatpush.msra.mxu1 %v272_v57 }
  0x34   :  { %410 = vmatpush.msra.mxu2 %v273_v58  ;;  %443 = vmatpush.msra.mxu3 %v274_v59 }
  0x35   :  { %341 = vmatpush.msra.mxu0 %v267_v60  ;;  %376 = vmatpush.msra.mxu1 %v268_v61 }
  0x36   :  { %411 = vmatpush.msra.mxu2 %v269_v62  ;;  %444 = vmatpush.msra.mxu3 %v270_v63 }
  0x37   :  { %342 = vmatpush.msra.mxu0 %v263_v3  ;;  %377 = vmatpush.msra.mxu1 %v264_v4 }
  0x38   :  { %412 = vmatpush.msra.mxu2 %v265_v5  ;;  %445 = vmatpush.msra.mxu3 %v266_v6 }
  0x39   :  { %343 = vmatpush.msra.mxu0 %v259_v7  ;;  %378 = vmatpush.msra.mxu1 %v260_v8  ;;  %v1010_v8 = vmov 24.0  }
  0x3a   :  { %413 = vmatpush.msra.mxu2 %v261_v10  ;;  %446 = vmatpush.msra.mxu3 %v262_v11 }
  0x3b   :  { %344 = vmatpush.msra.mxu0 %v255_v13  ;;  %379 = vmatpush.msra.mxu1 %v256_v14 }
  0x3c   :  { %414 = vmatpush.msra.mxu2 %v257_v16  ;;  %447 = vmatpush.msra.mxu3 %v258_v17 }
  0x8e   :  { %v157_v18 = vpop.xlane.xlu1 %156  ;;  %v105_v22 = vpop.xlane.xlu2 %104 }
  0x8f   :  { %v99_v19 = vpop.xlane.xlu0 %98  ;;  %v160_v20 = vmax.f32 %v157_v18, 1e-24  ;;  %v109_v23 = vmax.f32 %v105_v22, 1e-24 }
  0x90   :  { %v106_v21 = vmax.f32 %v99_v19, 1e-24 }
  0x91   :  { %710 = vrsqrt.f32 %v160_v20  ;;  %vm168_vm0 = vweird.f32 %v160_v20  ;;  %vm146_vm2 = vweird.f32 %v109_v23 }
  0x92   :  { %712 = vrsqrt.f32 %v106_v21  ;;  %vm116_vm6 = vweird.f32 %v106_v21 }
  0x93   :  { %714 = vrsqrt.f32 %v109_v23 }
  0x96   :  { %v103_v24 = vpop.xlane.xlu1 %102  ;;  %v159_v29 = vpop.xlane.xlu2 %158 }
  0x97   :  { %v101_v25 = vpop.xlane.xlu0 %100  ;;  %v711_v26 = vpop.eup %710  ;;  %v108_v27 = vmax.f32 %v103_v24, 1e-24  ;;  %v1113_v32 = vmax.f32 %v159_v29, 1e-24 }
  0x98   :  { %v1111_v28 = vmax.f32 %v101_v25, 1e-24  ;;  %v713_v30 = vpop.eup %712  ;;  %v163_v31 = vmul.f32 %v711_v26, %v160_v20  ;;  %vm169_vm1 = vweird.f32 %v711_v26 }
  0x99   :  { %v715_v33 = vpop.eup %714  ;;  %v111_v34 = vmul.f32 %v713_v30, %v106_v21  ;;  %716 = vrsqrt.f32 %v108_v27  ;;  %vm1117_vm4 = vmor %vm168_vm0, %vm169_vm1  ;;  %vm117_vm5 = vweird.f32 %v713_v30  ;;  %vm136_vm8 = vweird.f32 %v108_v27 }
  0x9a   :  { %v164_v35 = vmul.f32 %v711_v26, %v163_v31  ;;  %v141_v36 = vmul.f32 %v715_v33, %v109_v23  ;;  %718 = vrsqrt.f32 %v1111_v28  ;;  %vm147_vm3 = vweird.f32 %v715_v33  ;;  %vm118_vm9 = vmor %vm116_vm6, %vm117_vm5 }
  0x9b   :  { %v112_v37 = vmul.f32 %v713_v30, %v111_v34  ;;  %720 = vrsqrt.f32 %v1113_v32  ;;  %vm1121_vm7 = vmor %vm146_vm2, %vm147_vm3  ;;  %vm178_vm11 = vweird.f32 %v1113_v32  ;;  %vm126_vm15 = vweird.f32 %v1111_v28 }
  0x9c   :  { %v165_v38 = vmul.f32 0.5, %v164_v35  ;;  %v142_v39 = vmul.f32 %v715_v33, %v141_v36  ;;  %722 = vrcp.f32 %v1010_v8  ;;  %vm251_vm3 = vcmask 1041409  }
  0x9d   :  { %v113_v40 = vmul.f32 0.5, %v112_v37  ;;  %vm572_vm5 = vcmask 1043459   ;;  %vm574_vm6 = vcmask 1045509  }
  0x9e   :  { %v166_v41 = vsub.f32 1.5, %v165_v38  ;;  %v143_v42 = vmul.f32 0.5, %v142_v39 }
  0x9f   :  { %v717_v43 = vpop.eup %716  ;;  %v114_v45 = vsub.f32 1.5, %v113_v40 }
  0xa0   :  { %v719_v46 = vpop.eup %718  ;;  %v167_v47 = vmul.f32 %v711_v26, %v166_v41  ;;  %v144_v48 = vsub.f32 1.5, %v143_v42  ;;  %v131_v49 = vmul.f32 %v717_v43, %v108_v27  ;;  %vm137_vm10 = vweird.f32 %v717_v43 }
  0xa1   :  { %v721_v50 = vpop.eup %720  ;;  %v115_v51 = vmul.f32 %v713_v30, %v114_v45  ;;  %v121_v53 = vmul.f32 %v719_v46, %v1111_v28  ;;  %vm1144_vm13 = vmor %vm136_vm8, %vm137_vm10  ;;  %vm127_vm14 = vweird.f32 %v719_v46 }
  0xa2   :  { %v171_v54 = vsel %vm1117_vm4, %v711_v26, %v167_v47  ;;  %v145_v55 = vmul.f32 %v715_v33, %v144_v48  ;;  %v132_v56 = vmul.f32 %v717_v43, %v131_v49  ;;  %v173_v57 = vmul.f32 %v721_v50, %v1113_v32  ;;  %vm128_vm1 = vmor %vm126_vm15, %vm127_vm14  ;;  %v723_v24 = vpop.eup %722 }
  0xa3   :  { %v1130_v58 = vmul.f32 %v171_v54, %v1087_v0  ;;  %v119_v59 = vsel %vm118_vm9, %v713_v30, %v115_v51  ;;  %v122_v60 = vmul.f32 %v719_v46, %v121_v53  ;;  %vm179_vm12 = vweird.f32 %v721_v50 }
  0xa4   :  { %v150_v61 = vmul.f32 %v119_v59, %v1089_v1  ;;  %v149_v62 = vsel %vm1121_vm7, %v715_v33, %v145_v55  ;;  %v133_v63 = vmul.f32 0.5, %v132_v56  ;;  %v174_v3 = vmul.f32 %v721_v50, %v173_v57  ;;  %vm180_vm0 = vmor %vm178_vm11, %vm179_vm12 }
  0xa5   :  { %188 = vst [vmem:[#allocation13] sm:$0xff] %v1130_v58  ;;  %v1137_v4 = vmul.f32 %v149_v62, %v1091_v2  ;;  %v123_v5 = vmul.f32 0.5, %v122_v60  ;;  %v198_v21 = vmax.f32 %v1130_v58, 1e-06  ;;  %v231_v32 = vmul.f32 24.0, %v723_v24 }
  0xa6   :  { %192 = vst [vmem:[#allocation10 + $0x10] sm:$0xff] %v1130_v58  ;;  %v134_v0 = vsub.f32 1.5, %v133_v63  ;;  %v175_v6 = vmul.f32 0.5, %v174_v3  ;;  %345 = vmatmul.f32.vlgmr.msra.gmra.mxu0 %v150_v61  ;;  %380 = vmatmul.f32.vlgmr.msra.gmra.mxu1 %v150_v61  ;;  %v196_v14 = vmax.f32 %v150_v61, 1e-06  ;;  %vm235_vm2 = vweird.f32 %v723_v24 }
  0xa7   :  { %184 = vst [vmem:[#allocation11] sm:$0xff] %v150_v61  ;;  %v200_v1 = vmax.f32 %v1137_v4, 1e-06  ;;  %v124_v2 = vsub.f32 1.5, %v123_v5  ;;  %415 = vmatmul.f32.vlgmr.msra.gmra.mxu2 %v150_v61  ;;  %448 = vmatmul.f32.vlgmr.msra.gmra.mxu3 %v150_v61  ;;  %v232_v39 = vsub.f32 1.0, %v231_v32  ;;  %vm563_vm4 = vcmask 1041408  }
  0xa8   :  { %190 = vst [vmem:[#allocation10] sm:$0xff] %v150_v61  ;;  %v135_v10 = vmul.f32 %v717_v43, %v134_v0  ;;  %v176_v11 = vsub.f32 1.5, %v175_v6  ;;  %v202_v27 = vmul.f32 %v196_v14, %v196_v14  ;;  %vm576_vm7 = vcmask 1047559  }
  0xa9   :  { %187 = vst [vmem:[#allocation11 + $0x18] sm:$0xff] %v1137_v4  ;;  %v125_v13 = vmul.f32 %v719_v46, %v124_v2  ;;  %v206_v18 = vmul.f32 %v200_v1, %v200_v1  ;;  %v233_v44 = vmul.f32 %v723_v24, %v232_v39 }
  0xaa   :  { %194 = vst [vmem:[#allocation10 + $0x20] sm:$0xff] %v1137_v4  ;;  %v139_v16 = vsel %vm1144_vm13, %v717_v43, %v135_v10  ;;  %v177_v17 = vmul.f32 %v721_v50, %v176_v11  ;;  %v319_v10 = vld [vmem:[#allocation8] sm:$0xf] }
  0xab   :  { %v152_v19 = vmul.f32 %v139_v16, %v1099_v9  ;;  %v129_v20 = vsel %vm128_vm1, %v719_v46, %v125_v13  ;;  %v212_v29 = vmul.f32 %v206_v18, %v200_v1  ;;  %v234_v49 = vadd.f32 %v723_v24, %v233_v44 }
  0xac   :  { %v151_v22 = vmul.f32 %v129_v20, %v1101_v12  ;;  %v181_v23 = vsel %vm180_vm0, %v721_v50, %v177_v17  ;;  %v204_v12 = vmul.f32 %v198_v21, %v198_v21  ;;  %v1201_v11 = vperm.slane %v319_v10, 2 }
  0xad   :  { %v199_v25 = vmax.f32 %v152_v19, 1e-06  ;;  %186 = vst [vmem:[#allocation11 + $0x10] sm:$0xff] %v152_v19  ;;  %v1161_v26 = vmul.f32 %v181_v23, %v1103_v15  ;;  %v208_v15 = vmul.f32 %v202_v27, %v196_v14  ;;  %v1170_v54 = vsel %vm235_vm2, %v723_v24, %v234_v49 }
  0xae   :  { %193 = vst [vmem:[#allocation10 + $0x18] sm:$0xff] %v152_v19  ;;  %v197_v28 = vmax.f32 %v151_v22, 1e-06  ;;  %348 = vmatmul.f32.gmra.mxu0 %v151_v22  ;;  %383 = vmatmul.f32.gmra.mxu1 %v151_v22  ;;  %v210_v38 = vmul.f32 %v204_v12, %v198_v21  ;;  %v1203_v13 = vperm.slane %v319_v10, 3  ;;  %v1205_v14 = vperm.slane %v319_v10, 1 }
  0xaf   :  { %v205_v30 = vmul.f32 %v199_v25, %v199_v25  ;;  %185 = vst [vmem:[#allocation11 + $0x8] sm:$0xff] %v151_v22  ;;  %v201_v9 = vmax.f32 %v1161_v26, 1e-06  ;;  %418 = vmatmul.f32.gmra.mxu2 %v151_v22  ;;  %451 = vmatmul.f32.gmra.mxu3 %v151_v22  ;;  %v1211_v24 = vperm.slane %v319_v10, 0 }
  0xb0   :  { %v203_v31 = vmul.f32 %v197_v28, %v197_v28  ;;  %191 = vst [vmem:[#allocation10 + $0x8] sm:$0xff] %v151_v22  ;;  %613 = dma.vmem_to_hbm [thread:$0]  %s606_s12, 512, %s608_s10, [#allocation12], %s1003_s17, %s1003_s17, %s1004_s18  }
  0xb1   :  { %v211_v33 = vmul.f32 %v205_v30, %v199_v25  ;;  %v207_v34 = vmul.f32 %v201_v9, %v201_v9  ;;  %189 = vst [vmem:[#allocation13 + $0x8] sm:$0xff] %v1161_v26 }
  0xb2   :  { %v209_v35 = vmul.f32 %v203_v31, %v197_v28  ;;  %195 = vst [vmem:[#allocation10 + $0x28] sm:$0xff] %v1161_v26  ;;  %626 = dma.vmem_to_hbm [thread:$0]  %s619_s20, 256, %s621_s1, [#allocation12], %s1003_s17, %s1003_s17, %s1004_s18  }
  0xb3   :  { %v213_v36 = vmul.f32 %v207_v34, %v201_v9  ;;  %v222_v37 = vadd.f32 %v212_v29, %v211_v33  ;;  %600 = dma.vmem_to_hbm [thread:$0]  %s593_s19, 768, %s595_s15, [#allocation4], %s1003_s17, %s1003_s17, %s1004_s18  }
  0xb4   :  { %v214_v40 = vadd.f32 %v209_v35, %v208_v15 }
  0xb5   :  { %v223_v41 = vadd.f32 %v222_v37, %v213_v36 }
  0xb6   :  { %351 = vmatmul.f32.gmra.mxu0 %v1130_v58  ;;  %386 = vmatmul.f32.gmra.mxu1 %v1130_v58  ;;  %v215_v42 = vadd.f32 %v214_v40, %v210_v38 }
  0xb7   :  { %421 = vmatmul.f32.gmra.mxu2 %v1130_v58  ;;  %454 = vmatmul.f32.gmra.mxu3 %v1130_v58  ;;  %v224_v43 = vrot.slane %v223_v41, 4 }
  0xb8   :  { %v216_v45 = vrot.slane %v215_v42, 4 }
  0xb9   :  { %v225_v46 = vadd.f32 %v224_v43, %v223_v41 }
  0xba   :  { %v217_v47 = vadd.f32 %v216_v45, %v215_v42 }
  0xbb   :  { %v226_v48 = vrot.slane %v225_v46, 2 }
  0xbc   :  { %v218_v50 = vrot.slane %v217_v47, 2 }
  0xbd   :  { %v227_v51 = vadd.f32 %v226_v48, %v225_v46 }
  0xbe   :  { %354 = vmatmul.f32.gmra.mxu0 %v152_v19  ;;  %389 = vmatmul.f32.gmra.mxu1 %v152_v19  ;;  %v219_v52 = vadd.f32 %v218_v50, %v217_v47 }
  0xbf   :  { %423 = vmatmul.f32.gmra.mxu2 %v152_v19  ;;  %456 = vmatmul.f32.gmra.mxu3 %v152_v19  ;;  %v228_v53 = vrot.slane %v227_v51, 1 }
  0xc0   :  { %v220_v55 = vrot.slane %v219_v52, 1 }
  0xc1   :  { %v229_v56 = vadd.f32 %v228_v53, %v227_v51 }
  0xc2   :  { %v221_v57 = vadd.f32 %v220_v55, %v219_v52 }
  0xc3   :  { %v238_v58 = vmul.f32 %v1170_v54, %v229_v56 }
  0xc4   :  { %v237_v59 = vmul.f32 %v1170_v54, %v221_v57 }
  0xc5   :  { %724 = vlog2.f32 %v238_v58 }
  0xc6   :  { %357 = vmatmul.f32.gmra.mxu0 %v1137_v4  ;;  %392 = vmatmul.f32.gmra.mxu1 %v1137_v4  ;;  %726 = vlog2.f32 %v237_v59 }
  0xc7   :  { %426 = vmatmul.f32.gmra.mxu2 %v1137_v4  ;;  %459 = vmatmul.f32.gmra.mxu3 %v1137_v4 }
  0xcb   :  { %v725_v60 = vpop.eup %724 }
  0xcc   :  { %v727_v61 = vpop.eup %726  ;;  %v242_v62 = vmul.f32 0.6931472, %v725_v60 }
  0xcd   :  { %v240_v63 = vmul.f32 0.6931472, %v727_v61 }
  0xce   :  { %360 = vmatmul.f32.gmra.mxu0 %v1161_v26  ;;  %395 = vmatmul.f32.gmra.mxu1 %v1161_v26  ;;  %v244_v3 = vmul.f32 0.33333334, %v242_v62 }
  0xcf   :  { %429 = vmatmul.f32.gmra.mxu2 %v1161_v26  ;;  %462 = vmatmul.f32.gmra.mxu3 %v1161_v26  ;;  %v243_v5 = vmul.f32 0.33333334, %v240_v63 }
  0xd0   :  { %v247_v0 = vmul.f32 1.442695, %v244_v3 }
  0xd1   :  { %v245_v6 = vmul.f32 1.442695, %v243_v5 }
  0xd2   :  { %728 = vpow2.f32 %v247_v0 }
  0xd3   :  { %730 = vpow2.f32 %v245_v6 }
  0xd8   :  { %v729_v4 = vpop.eup %728 }
  0xd9   :  { %v731_v1 = vpop.eup %730 }
  0xda   :  { %v252_v7 = vsel %vm251_vm3, %v729_v4, %v731_v1 }
  0xdb   :  { %254 = vst [vmem:[#allocation16] sm:$0x3] %v252_v7 }
 0x123   :  { %v346_v2 = vpop.f32.mrf.mxu0  ;;  %v381_v8 = vpop.f32.mrf.mxu1 }
 0x124   :  { %v382_v22 = vadd.f32 %v381_v8, %v1205_v14  ;;  %v347_v28 = vadd.f32 %v346_v2, %v1211_v24 }
 0x126   :  { %v466_v27 = vmax.f32 %v382_v22, 1e-06  ;;  %v465_v37 = vmax.f32 %v347_v28, 1e-06 }
 0x128   :  { %v478_v15 = vmul.f32 %v466_v27, %v466_v27  ;;  %v477_v44 = vmul.f32 %v465_v37, %v465_v37 }
 0x12a   :  { %v416_v16 = vpop.f32.mrf.mxu2  ;;  %v449_v17 = vpop.f32.mrf.mxu3  ;;  %v490_v42 = vmul.f32 %v478_v15, %v466_v27  ;;  %v489_v55 = vmul.f32 %v477_v44, %v465_v37 }
 0x12b   :  { %v417_v18 = vadd.f32 %v416_v16, %v1201_v11  ;;  %v450_v19 = vadd.f32 %v449_v17, %v1203_v13  ;;  %v349_v20 = vpop.f32.mrf.mxu0  ;;  %v384_v21 = vpop.f32.mrf.mxu1 }
 0x12c   :  { %v385_v23 = vadd.f32 %v384_v21, %v1205_v14  ;;  %v350_v26 = vadd.f32 %v349_v20, %v1211_v24 }
 0x12d   :  { %580 = vst [vmem:[#allocation14] sm:$0xff] %v417_v18 }
 0x12e   :  { %581 = vst [vmem:[#allocation14 + $0x8] sm:$0xff] %v450_v19  ;;  %v468_v25 = vmax.f32 %v385_v23, 1e-06  ;;  %v467_v12 = vmax.f32 %v350_v26, 1e-06 }
 0x130   :  { %v480_v29 = vmul.f32 %v468_v25, %v468_v25  ;;  %v479_v41 = vmul.f32 %v467_v12, %v467_v12 }
 0x132   :  { %v419_v30 = vpop.f32.mrf.mxu2  ;;  %v452_v9 = vpop.f32.mrf.mxu3  ;;  %v492_v38 = vmul.f32 %v480_v29, %v468_v25  ;;  %v491_v50 = vmul.f32 %v479_v41, %v467_v12 }
 0x133   :  { %v420_v31 = vadd.f32 %v419_v30, %v1201_v11  ;;  %v453_v32 = vadd.f32 %v452_v9, %v1203_v13  ;;  %v352_v33 = vpop.f32.mrf.mxu0  ;;  %v387_v34 = vpop.f32.mrf.mxu1 }
 0x134   :  { %v353_v35 = vadd.f32 %v352_v33, %v1211_v24  ;;  %v388_v36 = vadd.f32 %v387_v34, %v1205_v14  ;;  %v509_v46 = vadd.f32 %v492_v38, %v490_v42  ;;  %v501_v57 = vadd.f32 %v491_v50, %v489_v55 }
 0x135   :  { %582 = vst [vmem:[#allocation14 + $0x10] sm:$0xff] %v420_v31 }
 0x136   :  { %583 = vst [vmem:[#allocation14 + $0x18] sm:$0xff] %v453_v32  ;;  %v469_v39 = vmax.f32 %v353_v35, 1e-06  ;;  %v470_v40 = vmax.f32 %v388_v36, 1e-06 }
 0x138   :  { %v482_v43 = vmul.f32 %v470_v40, %v470_v40  ;;  %v481_v45 = vmul.f32 %v469_v39, %v469_v39 }
 0x13a   :  { %v494_v47 = vmul.f32 %v482_v43, %v470_v40  ;;  %v422_v48 = vpop.f32.mrf.mxu2  ;;  %v455_v49 = vpop.f32.mrf.mxu3  ;;  %v493_v56 = vmul.f32 %v481_v45, %v469_v39 }
 0x13b   :  { %v355_v51 = vpop.f32.mrf.mxu0  ;;  %v390_v52 = vpop.f32.mrf.mxu1 }
 0x13c   :  { %v510_v53 = vadd.f32 %v509_v46, %v494_v47  ;;  %v502_v59 = vadd.f32 %v501_v57, %v493_v56  ;;  %v356_v6 = vadd.f32 %v355_v51, %v1211_v24  ;;  %v391_v4 = vadd.f32 %v390_v52, %v1205_v14 }
 0x13e   :  { %v511_v58 = vrot.slane %v510_v53, 4  ;;  %v503_v2 = vrot.slane %v502_v59, 4  ;;  %v471_v17 = vmax.f32 %v356_v6, 1e-06  ;;  %v472_v18 = vmax.f32 %v391_v4, 1e-06 }
 0x140   :  { %v512_v62 = vadd.f32 %v511_v58, %v510_v53  ;;  %v504_v19 = vadd.f32 %v503_v2, %v502_v59  ;;  %v483_v30 = vmul.f32 %v471_v17, %v471_v17  ;;  %v484_v9 = vmul.f32 %v472_v18, %v472_v18 }
 0x142   :  { %v424_v60 = vpop.f32.mrf.mxu2  ;;  %v457_v61 = vpop.f32.mrf.mxu3  ;;  %v513_v10 = vrot.slane %v512_v62, 2  ;;  %v505_v32 = vrot.slane %v504_v19, 2  ;;  %v495_v35 = vmul.f32 %v483_v30, %v471_v17  ;;  %v496_v36 = vmul.f32 %v484_v9, %v472_v18 }
 0x143   :  { %v425_v63 = vadd.f32 %v424_v60, %v1201_v11  ;;  %v458_v3 = vadd.f32 %v457_v61, %v1203_v13  ;;  %v358_v5 = vpop.f32.mrf.mxu0  ;;  %v393_v0 = vpop.f32.mrf.mxu1 }
 0x144   :  { %v359_v1 = vadd.f32 %v358_v5, %v1211_v24  ;;  %v394_v7 = vadd.f32 %v393_v0, %v1205_v14  ;;  %v514_v25 = vadd.f32 %v513_v10, %v512_v62 }
 0x145   :  { %584 = vst [vmem:[#allocation14 + $0x20] sm:$0xff] %v425_v63 }
 0x146   :  { %585 = vst [vmem:[#allocation14 + $0x28] sm:$0xff] %v458_v3  ;;  %v473_v8 = vmax.f32 %v359_v1, 1e-06  ;;  %v474_v16 = vmax.f32 %v394_v7, 1e-06 }
 0x148   :  { %v485_v20 = vmul.f32 %v473_v8, %v473_v8  ;;  %v486_v21 = vmul.f32 %v474_v16, %v474_v16 }
 0x14a   :  { %v427_v22 = vpop.f32.mrf.mxu2  ;;  %v460_v23 = vpop.f32.mrf.mxu3  ;;  %v497_v33 = vmul.f32 %v485_v20, %v473_v8  ;;  %v498_v34 = vmul.f32 %v486_v21, %v474_v16 }
 0x14b   :  { %v428_v26 = vadd.f32 %v427_v22, %v1201_v11  ;;  %v461_v27 = vadd.f32 %v460_v23, %v1203_v13  ;;  %v361_v28 = vpop.f32.mrf.mxu0  ;;  %v396_v29 = vpop.f32.mrf.mxu1  ;;  %v515_v13 = vrot.slane %v514_v25, 1 }
 0x14c   :  { %v362_v12 = vadd.f32 %v361_v28, %v1211_v24  ;;  %v397_v31 = vadd.f32 %v396_v29, %v1205_v14  ;;  %v506_v24 = vadd.f32 %v505_v32, %v504_v19  ;;  %v517_v14 = vadd.f32 %v497_v33, %v495_v35 }
 0x14d   :  { %586 = vst [vmem:[#allocation14 + $0x30] sm:$0xff] %v428_v26  ;;  %v525_v39 = vadd.f32 %v498_v34, %v496_v36  ;;  %v516_v44 = vadd.f32 %v515_v13, %v514_v25 }
 0x14e   :  { %587 = vst [vmem:[#allocation14 + $0x38] sm:$0xff] %v461_v27  ;;  %v475_v11 = vmax.f32 %v362_v12, 1e-06  ;;  %v476_v15 = vmax.f32 %v397_v31, 1e-06  ;;  %v507_v47 = vrot.slane %v506_v24, 1 }
 0x14f   :  { %639 = dma.vmem_to_hbm [thread:$0]  %s632_s6, 1024, %s634_s0, [#allocation15], %s1016_s7, %s1016_s7, %s1017_s8   ;;  %v534_v50 = vmul.f32 %v516_v44, %v1170_v54 }
 0x150   :  { %v487_v37 = vmul.f32 %v475_v11, %v475_v11  ;;  %v488_v38 = vmul.f32 %v476_v15, %v476_v15  ;;  %650 = dma.vmem_to_hbm [thread:$0]  %s646_s24, 32, %s648_s27, [#allocation15]   ;;  %v508_v53 = vadd.f32 %v507_v47, %v506_v24 }
 0x151   :  { %732 = vlog2.f32 %v534_v50 }
 0x152   :  { %v499_v40 = vmul.f32 %v487_v37, %v475_v11  ;;  %v500_v41 = vmul.f32 %v488_v38, %v476_v15  ;;  %v430_v42 = vpop.f32.mrf.mxu2  ;;  %v463_v43 = vpop.f32.mrf.mxu3  ;;  %v533_v59 = vmul.f32 %v508_v53, %v1170_v54 }
 0x154   :  { %v518_v45 = vadd.f32 %v517_v14, %v499_v40  ;;  %v526_v46 = vadd.f32 %v525_v39, %v500_v41  ;;  %734 = vlog2.f32 %v533_v59 }
 0x156   :  { %v519_v48 = vrot.slane %v518_v45, 4  ;;  %v527_v49 = vrot.slane %v526_v46, 4 }
 0x157   :  { %v733_v3 = vpop.eup %732 }
 0x158   :  { %v520_v51 = vadd.f32 %v519_v48, %v518_v45  ;;  %v528_v52 = vadd.f32 %v527_v49, %v526_v46  ;;  %v540_v6 = vmul.f32 0.6931472, %v733_v3 }
 0x15a   :  { %v521_v55 = vrot.slane %v520_v51, 2  ;;  %v529_v56 = vrot.slane %v528_v52, 2  ;;  %v735_v4 = vpop.eup %734  ;;  %v546_v1 = vmul.f32 0.33333334, %v540_v6 }
 0x15b   :  { %v538_v2 = vmul.f32 0.6931472, %v735_v4 }
 0x15c   :  { %v522_v57 = vadd.f32 %v521_v55, %v520_v51  ;;  %v530_v58 = vadd.f32 %v529_v56, %v528_v52  ;;  %v551_v16 = vmul.f32 1.442695, %v546_v1 }
 0x15d   :  { %v545_v19 = vmul.f32 0.33333334, %v538_v2 }
 0x15e   :  { %v523_v60 = vrot.slane %v522_v57, 1  ;;  %v531_v61 = vrot.slane %v530_v58, 1 }
 0x15f   :  { %v549_v23 = vmul.f32 1.442695, %v545_v19 }
 0x160   :  { %v524_v62 = vadd.f32 %v523_v60, %v522_v57  ;;  %v532_v63 = vadd.f32 %v531_v61, %v530_v58 }
 0x162   :  { %v535_v5 = vmul.f32 %v524_v62, %v1170_v54  ;;  %v536_v0 = vmul.f32 %v532_v63, %v1170_v54 }
 0x164   :  { %736 = vlog2.f32 %v535_v5 }
 0x165   :  { %738 = vlog2.f32 %v536_v0 }
 0x166   :  { %740 = vpow2.f32 %v551_v16 }
 0x16a   :  { %v737_v7 = vpop.eup %736 }
 0x16b   :  { %v739_v8 = vpop.eup %738  ;;  %v542_v10 = vmul.f32 0.6931472, %v737_v7 }
 0x16c   :  { %v544_v17 = vmul.f32 0.6931472, %v739_v8  ;;  %v741_v54 = vpop.eup %740 }
 0x16d   :  { %v547_v18 = vmul.f32 0.33333334, %v542_v10  ;;  %v561_v26 = vrot.slane %v741_v54, 6 }
 0x16e   :  { %v548_v20 = vmul.f32 0.33333334, %v544_v17 }
 0x16f   :  { %v553_v21 = vmul.f32 1.442695, %v547_v18 }
 0x170   :  { %v555_v22 = vmul.f32 1.442695, %v548_v20 }
 0x172   :  { %742 = vpow2.f32 %v555_v22 }
 0x173   :  { %744 = vpow2.f32 %v553_v21 }
 0x174   :  { %746 = vpow2.f32 %v549_v23 }
 0x178   :  { %v743_v25 = vpop.eup %742 }
 0x179   :  { %v562_v27 = vrot.slane %v743_v25, 6  ;;  %v745_v28 = vpop.eup %744 }
 0x17a   :  { %v747_v30 = vpop.eup %746 }
 0x17b   :  { %v565_v29 = vsel %vm563_vm4, %v745_v28, %v562_v27  ;;  %v564_v12 = vsel %vm563_vm4, %v747_v30, %v561_v26 }
 0x17c   :  { %v570_v9 = vrot.slane %v565_v29, 7 }
 0x17e   :  { %v571_v31 = vsel %vm251_vm3, %v570_v9, %v564_v12 }
 0x17f   :  { %v573_v32 = vsel %vm572_vm5, %v570_v9, %v571_v31 }
 0x180   :  { %v575_v33 = vsel %vm574_vm6, %v570_v9, %v573_v32 }
 0x181   :  { %v577_v34 = vsel %vm576_vm7, %v570_v9, %v575_v33 }
 0x182   :  { %579 = vst [vmem:[#allocation17] sm:$0xf] %v577_v34 }
 0x183   :  { %661 = dma.vmem_to_hbm [thread:$0]  %s657_s29, 64, %s659_s3, [#allocation18]  }
 0x184   :  { %994 = dma.done.wait [#allocation4], 768  }
 0x185   :  { %995 = vsyncadd [#allocation4], 4294966528 }
 0x186   :  { %996 = dma.done.wait [#allocation12], 768  }
 0x187   :  { %997 = vsyncadd [#allocation12], 4294966528 }
 0x188   :  { %998 = dma.done.wait [#allocation15], 1056  }
 0x189   :  { %999 = vsyncadd [#allocation15], 4294966240 }
 0x18a   :  { %1000 = dma.done.wait [#allocation18], 64  }
 0x18b   :  { %1001 = vsyncadd [#allocation18], 4294967232 }
 0x18c   :  { %686 = vsyncpa [#allocation3], 1 }
 0x18d   :  { %687 = vsyncpa [#allocation6], 1 }
 0x18e   :  { %688 = vsyncpa [#allocation9], 1 }
 0x18f   :  { %689 = vsyncpa [#allocation4], 1 }
 0x190   :  { %690 = vsyncpa [#allocation12], 1 }
 0x191   :  { %691 = vsyncpa [#allocation15], 1 }
 0x192   :  { %692 = vsyncpa [#allocation18], 1 }

</bundles_post_ra>
